<compile_context>
chip_gen: v7x
topology: tpu7x:2x2x1
jax: 0.10.0
libtpu: 0.0.40
codegen_flags: <defaults>
</compile_context>

<pallas_src>
import functools

import jax
import jax.numpy as jnp
from jax.experimental import pallas as pl
from jax.experimental.pallas import tpu as pltpu

_LANES = 128
_TARGET_BLOCK_BYTES = 2 * 1024 * 1024   # ~2 MiB per input block
_MIN_PALLAS_ELEMS = 256 * 1024          # below this, plain XLA is as fast


def _charbonnier_kernel(x_ref, y_ref, out_ref, *, eps: float,
                        tail_rows: int, tile_rows: int):
    # x_ref, y_ref: (tile_rows, 128) input blocks in VMEM (native dtype)
    # out_ref:      (1, 8, 128) f32 per-tile partial sums
    i = pl.program_id(0)
    eps2 = jnp.float32(eps * eps)

    diff = x_ref[...].astype(jnp.float32) - y_ref[...].astype(jnp.float32)
    val = jnp.sqrt(diff * diff + eps2)

    def _reduce(v):
        # (tile_rows, 128) -> (1, 8, 128): vreg-wise VPU adds, no cross-lane.
        return jnp.sum(v.reshape(-1, 8, _LANES), axis=0)[None]

    if tail_rows != tile_rows:
        # The last row block reads past the (rows, 128) array; the garbage
        # tail rows must be zeroed before accumulation.  This branch only
        # executes at runtime on the final grid step.
        last = pl.num_programs(0) - 1

        @pl.when(i == last)
        def _partial_tile():
            row_ids = jax.lax.broadcasted_iota(jnp.int32, val.shape, 0)
            masked = jnp.where(row_ids < tail_rows, val, jnp.float32(0.0))
            out_ref[...] = _reduce(masked)

        @pl.when(i != last)
        def _full_tile():
            out_ref[...] = _reduce(val)
    else:
        out_ref[...] = _reduce(val)


def charbonnier_loss(x: jax.Array, y: jax.Array, eps: float = 1e-3, *,
                     min_pallas_elems: int = _MIN_PALLAS_ELEMS) -> jax.Array:
    assert x.shape == y.shape, "x and y must have identical shapes"
    n = int(x.size)
    assert n > 0
    eps = float(eps)
    eps2 = jnp.float32(eps * eps)

    # Tiny inputs: fused XLA elementwise+reduce beats kernel launch overhead.
    if n < max(min_pallas_elems, _LANES):
        d = x.astype(jnp.float32) - y.astype(jnp.float32)
        return jnp.mean(jnp.sqrt(d * d + eps2))

    xf = jnp.reshape(x, (-1,))
    yf = jnp.reshape(y, (-1,))

    rows = n // _LANES
    main_elems = rows * _LANES
    tail_elems = n - main_elems

    if tail_elems:
        # Ragged remainder (< 128 elems): reduce it in plain JAX, fold into
        # the final mean.  Avoids padding the whole input.
        x_main, y_main = xf[:main_elems], yf[:main_elems]
        x_tail, y_tail = xf[main_elems:], yf[main_elems:]
    else:
        x_main, y_main = xf, yf
        x_tail = y_tail = None

    x2d = jnp.reshape(x_main, (rows, _LANES))
    y2d = jnp.reshape(y_main, (rows, _LANES))

    # Block sizing: ~2 MiB per input block -> 4096 rows f32 / 8192 rows bf16.
    itemsize = max(x.dtype.itemsize, y.dtype.itemsize)
    max_tile_rows = _TARGET_BLOCK_BYTES // (_LANES * itemsize)
    max_tile_rows = max(8, (max_tile_rows // 8) * 8)
    tile_rows = min(max_tile_rows, ((rows + 7) // 8) * 8)

    num_tiles = -(-rows // tile_rows)
    tail_rows = rows - (num_tiles - 1) * tile_rows

    kernel = functools.partial(
        _charbonnier_kernel, eps=eps, tail_rows=tail_rows, tile_rows=tile_rows)

    bytes_accessed = int(main_elems * x.dtype.itemsize
                         + main_elems * y.dtype.itemsize
                         + num_tiles * 8 * _LANES * 4)

    partials = pl.pallas_call(
        kernel,
        out_shape=jax.ShapeDtypeStruct((num_tiles, 8, _LANES), jnp.float32),
        grid_spec=pltpu.PrefetchScalarGridSpec(
            num_scalar_prefetch=0,
            grid=(num_tiles,),
            in_specs=[
                pl.BlockSpec((tile_rows, _LANES), lambda i: (i, 0)),
                pl.BlockSpec((tile_rows, _LANES), lambda i: (i, 0)),
            ],
            out_specs=pl.BlockSpec((1, 8, _LANES), lambda i: (i, 0, 0)),
        ),
        compiler_params=pltpu.CompilerParams(
            dimension_semantics=("parallel",),
        ),
        cost_estimate=pl.CostEstimate(
            flops=3 * main_elems, transcendentals=main_elems,
            bytes_accessed=bytes_accessed),
    )(x2d, y2d)

    total = jnp.sum(partials, dtype=jnp.float32)
    if tail_elems:
        td = x_tail.astype(jnp.float32) - y_tail.astype(jnp.float32)
        total = total + jnp.sum(jnp.sqrt(td * td + eps2), dtype=jnp.float32)
    return total / jnp.float32(n)


if __name__ == "__main__":
    key = jax.random.PRNGKey(0)
    kx, ky = jax.random.split(key)
    # NCHW, matching the PyTorch module's typical image inputs.
    x = jax.random.normal(kx, (2, 4, 16, 16), dtype=jnp.float32)
    y = jax.random.normal(ky, (2, 4, 16, 16), dtype=jnp.float32)

    # min_pallas_elems=0 forces the Pallas path even at this small demo size.
    loss = charbonnier_loss(x, y, eps=1e-3, min_pallas_elems=0)
    loss = jax.block_until_ready(loss)

    # Reference check in plain JAX.
    diff = x - y
    ref = jnp.mean(jnp.sqrt(diff * diff + 1e-3 * 1e-3))
    assert jnp.allclose(loss, ref, rtol=1e-5, atol=1e-6), (loss, ref)

    print("KERNEL_OK")
</pallas_src>

<mosaic_0001>
module attributes {stable_mosaic.version = 11 : i64} {
  func.func @_charbonnier_kernel(%arg0: i32, %arg1: memref<16x128xf32, #tpu.memory_space<vmem>>, %arg2: memref<16x128xf32, #tpu.memory_space<vmem>>, %arg3: memref<1x8x128xf32, #tpu.memory_space<vmem>>) attributes {dimension_semantics = [#tpu.dimension_semantics<parallel>], iteration_bounds = array<i64: 1>, scalar_prefetch = 0 : i64, scratch_operands = 0 : i64, tpu.core_type = #tpu.core_type<tc>, window_params = [{transform_indices = @transform_0, window_bounds = array<i64: 16, 128>}, {transform_indices = @transform_1, window_bounds = array<i64: 16, 128>}, {transform_indices = @transform_2, window_bounds = array<i64: 1, 8, 128>}]} {
    %c0 = arith.constant 0 : index
    %c0_0 = arith.constant 0 : index
    %0 = vector.load %arg1[%c0, %c0_0] : memref<16x128xf32, #tpu.memory_space<vmem>>, vector<16x128xf32>
    %c0_1 = arith.constant 0 : index
    %c0_2 = arith.constant 0 : index
    %1 = vector.load %arg2[%c0_1, %c0_2] : memref<16x128xf32, #tpu.memory_space<vmem>>, vector<16x128xf32>
    %2 = arith.subf %0, %1 : vector<16x128xf32>
    %3 = arith.mulf %2, %2 : vector<16x128xf32>
    %cst = arith.constant 9.99999997E-7 : f32
    %4 = vector.broadcast %cst : f32 to vector<16x128xf32>
    %5 = arith.addf %3, %4 : vector<16x128xf32>
    %6 = math.sqrt %5 : vector<16x128xf32>
    %7 = vector.shape_cast %6 : vector<16x128xf32> to vector<2x8x128xf32>
    %cst_3 = arith.constant dense<0.000000e+00> : vector<8x128xf32>
    %8 = vector.multi_reduction <add>, %7, %cst_3 [0] : vector<2x8x128xf32> to vector<8x128xf32>
    %9 = vector.shape_cast %8 : vector<8x128xf32> to vector<1x8x128xf32>
    %c0_4 = arith.constant 0 : index
    %c0_5 = arith.constant 0 : index
    %c0_6 = arith.constant 0 : index
    %10 = vector.load %arg3[%c0_4, %c0_5, %c0_6] : memref<1x8x128xf32, #tpu.memory_space<vmem>>, vector<1x8x128xf32>
    tpu.vector_store %arg3[%c0_4, %c0_5, %c0_6], %9 {strides = array<i32>} : memref<1x8x128xf32, #tpu.memory_space<vmem>>, vector<1x8x128xf32>,
    return
  }
  func.func @transform_0(%arg0: i32) -> (i32, i32) {
    %c0_i32 = arith.constant 0 : i32
    %c0_i32_0 = arith.constant 0 : i32
    return %arg0, %c0_i32 : i32, i32
  }
  func.func @transform_1(%arg0: i32) -> (i32, i32) {
    %c0_i32 = arith.constant 0 : i32
    %c0_i32_0 = arith.constant 0 : i32
    return %arg0, %c0_i32 : i32, i32
  }
  func.func @transform_2(%arg0: i32) -> (i32, i32, i32) {
    %c0_i32 = arith.constant 0 : i32
    %c0_i32_0 = arith.constant 0 : i32
    %c0_i32_1 = arith.constant 0 : i32
    return %arg0, %c0_i32, %c0_i32_0 : i32, i32, i32
  }
}

</mosaic_0001>

<bundles_post_ra>
// kernel: tpu_custom_call.1
= control target key start
LH: loop header
LB: loop body
LE: loop exit
PB: predicated region body
PF: predicated region fallthrough
CT: control target
= control target key end

     0   :  { %7 = vsyncpa [#allocation3], 0  ;;  %s219_s0 = inlined_call_operand.hbm [shape: f32[16,128], index: 0, kind: input, shape index: {}]   ;;  %s220_s1 = inlined_call_operand.hbm [shape: f32[16,128], index: 1, kind: input, shape index: {}]   ;;  %s221_s2 = inlined_call_operand.hbm [shape: f32[1,8,128], index: 2, kind: output, shape index: {}]  }
   0x1   :  { %8 = vsyncpa [#allocation6], 0 }
   0x2   :  { %9 = vsyncpa [#allocation4], 0  ;;  %s163_s9 = smov [#allocation2]   ;;  %s91_s13 = scalar_lea.hbm %s219_s0, 256 }
   0x3   :  { %s15_s10 = sshll.u32 %s163_s9, 4  ;;  %p92_p0 = scmp.ne.s32.totalorder %s219_s0, %s91_s13  ;;  %s16_s10 = int_to_ptr.vmem [resolvable:$true] %s15_s10 }
   0x4   :  { %p95_p1 = scmp.lt.u32.totalorder %s91_s13, %s219_s0 }
   0x6   :  { %p97_p2 = pnand %p95_p1, %p92_p0 }
   0x8   :  { %100 = shalt.err (!%p97_p2)
}
   0x9   :  { %s101_s18 = scalar_lea.vmem %s16_s10, 256  ;;  %p106_p4 = scmp.lt.s32.totalorder %s16_s10, %s16_s10 }
   0xa   :  { %p102_p3 = scmp.ne.s32.totalorder %s16_s10, %s101_s18  ;;  %p107_p5 = scmp.lt.s32.totalorder %s101_s18, %s101_s18 }
   0xc   :  { %p108_p6 = por %p107_p5, %p106_p4 }
   0xe   :  { %p109_p7 = pnand %p108_p6, %p102_p3 }
  0x10   :  { %112 = shalt.err (!%p109_p7)
}
  0x11   :  { %s164_s19 = smov 128   ;;  %s165_s20 = smov 8  }
  0x12   :  { %21 = dma.hbm_to_vmem [thread:$0]  %s219_s0, 256, %s16_s10, [#allocation3], %s164_s19, %s164_s19, %s165_s20  }
  0x13   :  { %s166_s23 = smov [#allocation5]   ;;  %s113_s27 = scalar_lea.hbm %s220_s1, 256 }
  0x14   :  { %s27_s24 = sshll.u32 %s166_s23, 4  ;;  %p114_p8 = scmp.ne.s32.totalorder %s220_s1, %s113_s27  ;;  %s28_s24 = int_to_ptr.vmem [resolvable:$true] %s27_s24 }
  0x15   :  { %p117_p9 = scmp.lt.u32.totalorder %s113_s27, %s220_s1 }
  0x17   :  { %p119_p10 = pnand %p117_p9, %p114_p8 }
  0x19   :  { %122 = shalt.err (!%p119_p10)
}
  0x1a   :  { %s123_s4 = scalar_lea.vmem %s28_s24, 256  ;;  %p128_p12 = scmp.lt.s32.totalorder %s28_s24, %s28_s24 }
  0x1b   :  { %p124_p11 = scmp.ne.s32.totalorder %s28_s24, %s123_s4  ;;  %p129_p13 = scmp.lt.s32.totalorder %s123_s4, %s123_s4 }
  0x1d   :  { %p130_p0 = por %p129_p13, %p128_p12 }
  0x1f   :  { %p131_p1 = pnand %p130_p0, %p124_p11 }
  0x21   :  { %134 = shalt.err (!%p131_p1)
}
  0x22   :  { %33 = dma.hbm_to_vmem [thread:$0]  %s220_s1, 256, %s28_s24, [#allocation6], %s164_s19, %s164_s19, %s165_s20  }
  0x23   :  { %157 = dma.done.wait [#allocation3], 256  }
  0x24   :  { %158 = vsyncadd [#allocation3], 4294967040 }
  0x25   :  { %159 = dma.done.wait [#allocation6], 256  }
  0x26   :  { %160 = vsyncadd [#allocation6], 4294967040  ;;  %v40_v0 = vld [vmem:[#allocation2] sm:$0xff]  ;;  %v41_v1 = vld [vmem:[#allocation2 + $0x8] sm:$0xff]  ;;  %s167_s1 = smov [#allocation7]  }
  0x27   :  { %v42_v2 = vld [vmem:[#allocation5] sm:$0xff]  ;;  %v43_v3 = vld [vmem:[#allocation5 + $0x8] sm:$0xff]  ;;  %s72_s6 = sshll.u32 %s167_s1, 4  ;;  %s73_s6 = int_to_ptr.vmem [resolvable:$true] %s72_s6 }
  0x28   :  { %v44_v4 = vsub.f32 %v40_v0, %v42_v2  ;;  %v45_v5 = vsub.f32 %v41_v1, %v43_v3  ;;  %s135_s7 = scalar_lea.vmem %s73_s6, 128  ;;  %p140_p3 = scmp.lt.s32.totalorder %s73_s6, %s73_s6 }
  0x29   :  { %p136_p2 = scmp.ne.s32.totalorder %s73_s6, %s135_s7  ;;  %p141_p4 = scmp.lt.s32.totalorder %s135_s7, %s135_s7 }
  0x2a   :  { %v46_v6 = vmul.f32 %v44_v4, %v44_v4  ;;  %v47_v7 = vmul.f32 %v45_v5, %v45_v5 }
  0x2b   :  { %p142_p5 = por %p141_p4, %p140_p3 }
  0x2c   :  { %v48_v8 = vadd.f32 1e-06, %v46_v6  ;;  %v49_v9 = vadd.f32 1e-06, %v47_v7 }
  0x2d   :  { %p143_p6 = pnand %p142_p5, %p136_p2 }
  0x2e   :  { %87 = vrsqrt.f32 %v48_v8  ;;  %vm52_vm0 = vcmp.eq.f32.partialorder %v48_v8, inf  ;;  %v55_v11 = vand.u32 2147483648, %v48_v8  ;;  %vm54_vm1 = vcmp.eq.f32.partialorder %v48_v8, 0.0 }
  0x2f   :  { %89 = vrsqrt.f32 %v49_v9  ;;  %vm59_vm2 = vcmp.eq.f32.partialorder %v49_v9, inf  ;;  %v62_v14 = vand.u32 2147483648, %v49_v9  ;;  %vm61_vm3 = vcmp.eq.f32.partialorder %v49_v9, 0.0 }
  0x38   :  { %v88_v10 = vpop.eup %87 }
  0x39   :  { %v90_v12 = vpop.eup %89  ;;  %v51_v13 = vmul.f32 %v88_v10, %v48_v8 }
  0x3a   :  { %v58_v15 = vmul.f32 %v90_v12, %v49_v9 }
  0x3b   :  { %v53_v16 = vsel %vm52_vm0, %v48_v8, %v51_v13 }
  0x3c   :  { %v56_v17 = vsel %vm54_vm1, %v55_v11, %v53_v16  ;;  %v60_v18 = vsel %vm59_vm2, %v49_v9, %v58_v15 }
  0x3d   :  { %v63_v19 = vsel %vm61_vm3, %v62_v14, %v60_v18 }
  0x3e   :  { %v64_v20 = vadd.f32 %v63_v19, %v56_v17 }
  0x40   :  { %65 = vst [vmem:[#allocation7] sm:$0xff] %v64_v20 }
  0x41   :  { %146 = shalt.err (!%p143_p6)
}
  0x42   :  { %s147_s10 = scalar_lea.hbm %s221_s2, 128 }
  0x43   :  { %p148_p7 = scmp.ne.s32.totalorder %s221_s2, %s147_s10  ;;  %p151_p8 = scmp.lt.u32.totalorder %s147_s10, %s221_s2 }
  0x45   :  { %p153_p9 = pnand %p151_p8, %p148_p7 }
  0x47   :  { %156 = shalt.err (!%p153_p9)
}
  0x48   :  { %75 = dma.vmem_to_hbm [thread:$0]  %s73_s6, 128, %s221_s2, [#allocation4]  }
  0x49   :  { %161 = dma.done.wait [#allocation4], 128  }
  0x4a   :  { %162 = vsyncadd [#allocation4], 4294967168 }
  0x4b   :  { %79 = vsyncpa [#allocation3], 1 }
  0x4c   :  { %80 = vsyncpa [#allocation6], 1 }
  0x4d   :  { %81 = vsyncpa [#allocation4], 1 }

</bundles_post_ra>
